<compile_context>
chip_gen: v7x
topology: tpu7x:2x2x1
jax: 0.10.0
libtpu: 0.0.40
codegen_flags: <defaults>
</compile_context>

<pallas_src>
import jax
import jax.numpy as jnp
from jax.experimental import pallas as pl
from jax.experimental.pallas import tpu as pltpu


# ----------------------------------------------------------------------------
# Pallas kernel: one (channels, tile_hw) slab of one image per grid step.
# ----------------------------------------------------------------------------
def _attention_gate_kernel(gate_ref, skip_ref, wg_ref, wx_ref, b_ref,
                           wp_ref, bp_ref, out_ref):
    # gate_ref : (1, F_g, T)      skip_ref : (1, F_l, T)   (storage dtype)
    # wg_ref   : (C, F_g)         wx_ref   : (C, F_l)      (storage dtype)
    # b_ref    : (C, 1) f32       wp_ref   : (1, C) f32    bp_ref: (1,) f32 SMEM
    # out_ref  : (1, F_l, T)
    g = gate_ref[0]                       # (F_g, T)
    s = skip_ref[0]                       # (F_l, T)

    # h = BN(conv1x1(gate)) + BN(conv1x1(skip)); BN folded into wg/wx and b.
    # Two dots sharing an f32 accumulator (no concat materialized).
    h = (jnp.dot(wg_ref[...], g, preferred_element_type=jnp.float32)
         + jnp.dot(wx_ref[...], s, preferred_element_type=jnp.float32)
         + b_ref[...])                    # (C, T), f32
    a = jnp.maximum(h, 0.0)               # relu, f32

    # psi = sigmoid(BN(conv1x1(a))): (1, C) @ (C, T) row matmul, kept in f32
    # (activations are NOT down-cast; wp is tiny so f32 weights are free).
    p = jnp.dot(wp_ref[...], a, preferred_element_type=jnp.float32) + bp_ref[0]
    p = jax.nn.sigmoid(p)                 # (1, T), f32

    # out = skip * psi.  Cast only the (1, T) psi row down to the storage dtype
    # so a bf16 skip tile never takes a full-tile f32 round-trip.
    out_ref[0] = (s * p.astype(s.dtype)).astype(out_ref.dtype)


# ----------------------------------------------------------------------------
# Parameter glue: fold eval-mode BatchNorm into the 1x1 convs.
# ----------------------------------------------------------------------------
def _fold_bn(w, b, bn, eps=1e-5):
    """w: (C_out, C_in) 1x1 conv weight, b: (C_out,) conv bias.
    Returns (w_f, b_f) such that  w_f @ x + b_f == BN(w @ x + b)."""
    scale = bn["gamma"] / jnp.sqrt(bn["var"] + eps)      # (C_out,)
    return w * scale[:, None], scale * (b - bn["mean"]) + bn["beta"]


# ----------------------------------------------------------------------------
# Tile / VMEM planning (generation-aware).
# ----------------------------------------------------------------------------
def _vmem_capacity_bytes():
    try:
        cap = getattr(pltpu.get_tpu_info(), "vmem_capacity_bytes", None)
        if cap:
            return int(cap)
    except Exception:
        pass
    return 64 << 20          # conservative fallback = v7x (smallest VMEM)


def _plan(N, HW, F_g, F_l, C, itemsize):
    """Choose tile_hw (multiple of 128 dividing HW), input-buffer depth, and an
    explicit VMEM limit.  Budget ~40% of physical VMEM for pipeline buffers +
    live f32 intermediates: v7x (64 MiB) -> ~25 MiB, v5e/v6e (128 MiB) -> ~51 MiB."""
    cap_bytes = _vmem_capacity_bytes()
    budget = (2 * cap_bytes) // 5

    # Bytes per pixel column while one grid step is live:
    #   2x pipeline buffers for gate / skip / out in the storage dtype,
    #   plus f32 intermediates: h & a (C each), psi (1), pre-store temp (~F_l),
    #   plus slack for one more (F_l, T)-sized temporary.
    per_col = (2 * (F_g + 2 * F_l) * itemsize
               + (2 * C + 2 * F_l + 1) * 4)
    max_tile = min(32768, max(128, budget // per_col))

    # Guarantee >=2 total grid steps so both v7x TensorCores get work.  With
    # N >= 2 the batch axis already provides them; for N == 1 cap the tile.
    if N == 1 and HW >= 256:
        max_tile = min(max_tile, HW // 2)

    tile, t = 128, 128
    while t <= min(HW, max_tile):
        if HW % t == 0:
            tile = t
        t += 128
    steps_hw = HW // tile

    # Deepen input buffering only when per-step DMAs are tiny and there are
    # enough HW steps for the extra prefetch depth to matter.
    in_bytes = (F_g + F_l) * tile * itemsize
    n_in_buf = 3 if (steps_hw >= 3 and in_bytes <= (512 << 10)) else 2

    need = (n_in_buf * (F_g + F_l) * tile * itemsize     # gate + skip buffers
            + 2 * F_l * tile * itemsize                  # out buffers
            + (2 * C + 2 * F_l + 1) * 4 * tile           # f32 intermediates
            + (C * (F_g + F_l) + 4 * C + 64) * 4)        # weights / biases
    vmem_limit = int(min(cap_bytes, max(need + (8 << 20), 32 << 20)))
    return tile, n_in_buf, vmem_limit


# ----------------------------------------------------------------------------
# Wrapper (NCHW in / NCHW out, like the PyTorch module).
# ----------------------------------------------------------------------------
@jax.jit
def attention_block(gate, skip, params):
    """gate: (N, F_g, H, W), skip: (N, F_l, H, W).  Output dtype == skip dtype.
    Pass bf16 gate/skip to halve HBM traffic; kernel math stays in f32."""
    N, F_g, H, W = gate.shape
    _, F_l, _, _ = skip.shape
    HW = H * W

    # Fold BN into the three 1x1 convs.
    wg, bg = _fold_bn(params["wg"], params["bg"], params["bn_g"])
    wx, bx = _fold_bn(params["wx"], params["bx"], params["bn_x"])
    wp, bp = _fold_bn(params["wp"], params["bp"], params["bn_p"])
    C = wg.shape[0]

    cdt = gate.dtype                       # big matmul inputs stay in storage dtype
    wg = wg.astype(cdt)
    wx = wx.astype(cdt)
    wp = wp.astype(jnp.float32).reshape(1, C)              # tiny; keep f32
    b_sum = (bg + bx).astype(jnp.float32).reshape(C, 1)    # g1-bias + x1-bias
    bp = bp.astype(jnp.float32).reshape(1)                  # SMEM scalar

    # NCHW -> (N, C, H*W): pure reshape, no transpose.
    gate3 = gate.reshape(N, F_g, HW)
    skip3 = skip.reshape(N, F_l, HW)

    assert HW % 128 == 0, "H*W must be a multiple of 128"
    tile_hw, n_in_buf, vmem_limit = _plan(N, HW, F_g, F_l, C,
                                          jnp.dtype(cdt).itemsize)
    grid = (N, HW // tile_hw)

    def _in_spec(nchan):
        block = (1, nchan, tile_hw)
        idx = lambda n, t: (n, 0, t)
        if n_in_buf > 2:
            try:
                return pl.BlockSpec(block, idx,
                                    pipeline_mode=pl.Buffered(n_in_buf))
            except TypeError:   # older jax without pipeline_mode kwarg
                pass
        return pl.BlockSpec(block, idx)

    out3 = pl.pallas_call(
        _attention_gate_kernel,
        out_shape=jax.ShapeDtypeStruct((N, F_l, HW), skip.dtype),
        grid=grid,
        in_specs=[
            _in_spec(F_g),                                            # gate
            _in_spec(F_l),                                            # skip
            pl.BlockSpec((C, F_g), lambda n, t: (0, 0)),              # wg (folded)
            pl.BlockSpec((C, F_l), lambda n, t: (0, 0)),              # wx (folded)
            pl.BlockSpec((C, 1), lambda n, t: (0, 0)),                # bg+bx
            pl.BlockSpec((1, C), lambda n, t: (0, 0)),                # wp (folded)
            pl.BlockSpec(memory_space=pltpu.MemorySpace.SMEM),        # bp scalar
        ],
        out_specs=pl.BlockSpec((1, F_l, tile_hw), lambda n, t: (n, 0, t)),
        compiler_params=pltpu.CompilerParams(
            dimension_semantics=("parallel", "parallel"),
            vmem_limit_bytes=vmem_limit),
    )(gate3, skip3, wg, wx, b_sum, wp, bp)

    return out3.reshape(N, F_l, H, W)


# ----------------------------------------------------------------------------
# Plain-JAX reference (same eval-mode BN semantics).
# ----------------------------------------------------------------------------
def attention_block_ref(gate, skip, params):
    def conv_bn(x, w, b, bn):
        y = jnp.einsum("nchw,dc->ndhw", x, w) + b[None, :, None, None]
        scale = bn["gamma"] / jnp.sqrt(bn["var"] + 1e-5)
        return (scale[None, :, None, None]
                * (y - bn["mean"][None, :, None, None])
                + bn["beta"][None, :, None, None])

    g1 = conv_bn(gate, params["wg"], params["bg"], params["bn_g"])
    x1 = conv_bn(skip, params["wx"], params["bx"], params["bn_x"])
    a = jnp.maximum(g1 + x1, 0.0)
    p = jax.nn.sigmoid(conv_bn(a, params["wp"], params["bp"], params["bn_p"]))
    return skip * p


def make_params(key, F_g, F_l, C):
    ks = jax.random.split(key, 9)

    def bn(k, n):
        k1, k2, k3, k4 = jax.random.split(k, 4)
        return dict(gamma=1.0 + 0.1 * jax.random.normal(k1, (n,), jnp.float32),
                    beta=0.1 * jax.random.normal(k2, (n,), jnp.float32),
                    mean=0.1 * jax.random.normal(k3, (n,), jnp.float32),
                    var=0.5 + jax.random.uniform(k4, (n,), jnp.float32))

    return dict(
        wg=0.3 * jax.random.normal(ks[0], (C, F_g), jnp.float32),
        bg=0.1 * jax.random.normal(ks[1], (C,), jnp.float32),
        wx=0.3 * jax.random.normal(ks[2], (C, F_l), jnp.float32),
        bx=0.1 * jax.random.normal(ks[3], (C,), jnp.float32),
        wp=0.3 * jax.random.normal(ks[4], (1, C), jnp.float32),
        bp=0.1 * jax.random.normal(ks[5], (1,), jnp.float32),
        bn_g=bn(ks[6], C),
        bn_x=bn(ks[7], C),
        bn_p=bn(ks[8], 1),
    )


if __name__ == "__main__":
    key = jax.random.PRNGKey(0)
    k_g, k_s, k_p = jax.random.split(key, 3)

    # att4 shapes in the module (F_g=32, F_l=32, n_coefficients=16), small N/H/W.
    N, F_g, F_l, C, H, W = 2, 32, 32, 16, 32, 32
    gate = jax.random.normal(k_g, (N, F_g, H, W), jnp.float32)
    skip = jax.random.normal(k_s, (N, F_l, H, W), jnp.float32)
    params = make_params(k_p, F_g, F_l, C)

    # f32 storage path (tight tolerance against the f32 reference).
    out = attention_block(gate, skip, params)
    jax.block_until_ready(out)
    ref = attention_block_ref(gate, skip, params)
    assert out.shape == skip.shape
    assert jnp.max(jnp.abs(out - ref)) < 1e-4

    # bf16 storage path (halves HBM bytes on this memory-bound kernel); compare
    # against the f32 reference of the bf16-rounded inputs with a loose bound.
    gate_b = gate.astype(jnp.bfloat16)
    skip_b = skip.astype(jnp.bfloat16)
    out_b = attention_block(gate_b, skip_b, params)
    jax.block_until_ready(out_b)
    ref_b = attention_block_ref(gate_b.astype(jnp.float32),
                                skip_b.astype(jnp.float32), params)
    diff = jnp.abs(out_b.astype(jnp.float32) - ref_b)
    assert out_b.dtype == jnp.bfloat16
    assert jnp.max(diff) < 2.5e-1 and jnp.mean(diff) < 2e-2

    print("KERNEL_OK")
</pallas_src>

<mosaic_0001>
module attributes {stable_mosaic.version = 11 : i64} {
  func.func @_attention_gate_kernel(%arg0: i32, %arg1: i32, %arg2: memref<1x32x1024xf32, #tpu.memory_space<vmem>>, %arg3: memref<1x32x1024xf32, #tpu.memory_space<vmem>>, %arg4: memref<16x32xf32, #tpu.memory_space<vmem>>, %arg5: memref<16x32xf32, #tpu.memory_space<vmem>>, %arg6: memref<16x1xf32, #tpu.memory_space<vmem>>, %arg7: memref<1x16xf32, #tpu.memory_space<vmem>>, %arg8: memref<1xf32, #tpu.memory_space<smem>>, %arg9: memref<1x32x1024xf32, #tpu.memory_space<vmem>>) attributes {dimension_semantics = [#tpu.dimension_semantics<parallel>, #tpu.dimension_semantics<parallel>], iteration_bounds = array<i64: 2, 1>, scalar_prefetch = 0 : i64, scratch_operands = 0 : i64, tpu.core_type = #tpu.core_type<tc>, window_params = [{transform_indices = @transform_0, window_bounds = array<i64: 1, 32, 1024>}, {transform_indices = @transform_1, window_bounds = array<i64: 1, 32, 1024>}, {pipeline_mode = #tpu.pipeline_mode<synchronous>, transform_indices = @transform_2, window_bounds = array<i64: 16, 32>}, {pipeline_mode = #tpu.pipeline_mode<synchronous>, transform_indices = @transform_3, window_bounds = array<i64: 16, 32>}, {pipeline_mode = #tpu.pipeline_mode<synchronous>, transform_indices = @transform_4, window_bounds = array<i64: 16, 1>}, {pipeline_mode = #tpu.pipeline_mode<synchronous>, transform_indices = @transform_5, window_bounds = array<i64: 1, 16>}, {transform_indices = @transform_6, window_bounds = array<i64: 1>}, {transform_indices = @transform_7, window_bounds = array<i64: 1, 32, 1024>}]} {
    %c0 = arith.constant 0 : index
    %c0_0 = arith.constant 0 : index
    %c0_1 = arith.constant 0 : index
    %0 = vector.load %arg2[%c0, %c0_0, %c0_1] : memref<1x32x1024xf32, #tpu.memory_space<vmem>>, vector<1x32x1024xf32>
    %1 = vector.shape_cast %0 : vector<1x32x1024xf32> to vector<32x1024xf32>
    %c0_2 = arith.constant 0 : index
    %c0_3 = arith.constant 0 : index
    %c0_4 = arith.constant 0 : index
    %2 = vector.load %arg3[%c0_2, %c0_3, %c0_4] : memref<1x32x1024xf32, #tpu.memory_space<vmem>>, vector<1x32x1024xf32>
    %3 = vector.shape_cast %2 : vector<1x32x1024xf32> to vector<32x1024xf32>
    %c0_5 = arith.constant 0 : index
    %c0_6 = arith.constant 0 : index
    %4 = vector.load %arg4[%c0_5, %c0_6] : memref<16x32xf32, #tpu.memory_space<vmem>>, vector<16x32xf32>
    %cst = arith.constant dense<0.000000e+00> : vector<16x1024xf32>
    %5 = tpu.matmul %4, %1, %cst {dimension_numbers = #tpu.dot_dimension_numbers<[1], [0], [0], [1], [0, 0, 1, 1], [], []>} : vector<16x32xf32>, vector<32x1024xf32>, vector<16x1024xf32> -> vector<16x1024xf32>
    %c0_7 = arith.constant 0 : index
    %c0_8 = arith.constant 0 : index
    %6 = vector.load %arg5[%c0_7, %c0_8] : memref<16x32xf32, #tpu.memory_space<vmem>>, vector<16x32xf32>
    %cst_9 = arith.constant dense<0.000000e+00> : vector<16x1024xf32>
    %7 = tpu.matmul %6, %3, %cst_9 {dimension_numbers = #tpu.dot_dimension_numbers<[1], [0], [0], [1], [0, 0, 1, 1], [], []>} : vector<16x32xf32>, vector<32x1024xf32>, vector<16x1024xf32> -> vector<16x1024xf32>
    %8 = arith.addf %5, %7 : vector<16x1024xf32>
    %c0_10 = arith.constant 0 : index
    %c0_11 = arith.constant 0 : index
    %9 = vector.load %arg6[%c0_10, %c0_11] : memref<16x1xf32, #tpu.memory_space<vmem>>, vector<16x1xf32>
    %10 = vector.broadcast %9 : vector<16x1xf32> to vector<16x1024xf32>
    %11 = arith.addf %8, %10 : vector<16x1024xf32>
    %cst_12 = arith.constant 0.000000e+00 : f32
    %12 = vector.broadcast %cst_12 : f32 to vector<16x1024xf32>
    %13 = arith.maximumf %11, %12 : vector<16x1024xf32>
    %c0_13 = arith.constant 0 : index
    %c0_14 = arith.constant 0 : index
    %14 = vector.load %arg7[%c0_13, %c0_14] : memref<1x16xf32, #tpu.memory_space<vmem>>, vector<1x16xf32>
    %cst_15 = arith.constant dense<0.000000e+00> : vector<1x1024xf32>
    %15 = tpu.matmul %14, %13, %cst_15 {dimension_numbers = #tpu.dot_dimension_numbers<[1], [0], [0], [1], [0, 0, 1, 1], [], []>} : vector<1x16xf32>, vector<16x1024xf32>, vector<1x1024xf32> -> vector<1x1024xf32>
    %c0_16 = arith.constant 0 : index
    %16 = memref.load %arg8[%c0_16] : memref<1xf32, #tpu.memory_space<smem>>
    %17 = vector.broadcast %16 : f32 to vector<1x1024xf32>
    %18 = arith.addf %15, %17 : vector<1x1024xf32>
    %19 = arith.negf %18 : vector<1x1024xf32>
    %20 = math.exp %19 : vector<1x1024xf32>
    %cst_17 = arith.constant 1.000000e+00 : f32
    %21 = vector.broadcast %cst_17 : f32 to vector<1x1024xf32>
    %22 = arith.addf %21, %20 : vector<1x1024xf32>
    %23 = arith.divf %21, %22 : vector<1x1024xf32>
    %24 = vector.broadcast %23 : vector<1x1024xf32> to vector<32x1024xf32>
    %25 = arith.mulf %3, %24 : vector<32x1024xf32>
    %c0_18 = arith.constant 0 : index
    %c0_19 = arith.constant 0 : index
    %c0_20 = arith.constant 0 : index
    %26 = vector.load %arg9[%c0_18, %c0_19, %c0_20] : memref<1x32x1024xf32, #tpu.memory_space<vmem>>, vector<1x32x1024xf32>
    %27 = vector.shape_cast %26 : vector<1x32x1024xf32> to vector<32x1024xf32>
    %28 = vector.shape_cast %25 : vector<32x1024xf32> to vector<1x32x1024xf32>
    tpu.vector_store %arg9[%c0_18, %c0_19, %c0_20], %28 {strides = array<i32>} : memref<1x32x1024xf32, #tpu.memory_space<vmem>>, vector<1x32x1024xf32>,
    return
  }
  func.func @transform_0(%arg0: i32, %arg1: i32) -> (i32, i32, i32) {
    %c0_i32 = arith.constant 0 : i32
    %c0_i32_0 = arith.constant 0 : i32
    return %arg0, %c0_i32, %arg1 : i32, i32, i32
  }
  func.func @transform_1(%arg0: i32, %arg1: i32) -> (i32, i32, i32) {
    %c0_i32 = arith.constant 0 : i32
    %c0_i32_0 = arith.constant 0 : i32
    return %arg0, %c0_i32, %arg1 : i32, i32, i32
  }
  func.func @transform_2(%arg0: i32, %arg1: i32) -> (i32, i32) {
    %c0_i32 = arith.constant 0 : i32
    %c0_i32_0 = arith.constant 0 : i32
    %c0_i32_1 = arith.constant 0 : i32
    return %c0_i32, %c0_i32_0 : i32, i32
  }
  func.func @transform_3(%arg0: i32, %arg1: i32) -> (i32, i32) {
    %c0_i32 = arith.constant 0 : i32
    %c0_i32_0 = arith.constant 0 : i32
    %c0_i32_1 = arith.constant 0 : i32
    return %c0_i32, %c0_i32_0 : i32, i32
  }
  func.func @transform_4(%arg0: i32, %arg1: i32) -> (i32, i32) {
    %c0_i32 = arith.constant 0 : i32
    %c0_i32_0 = arith.constant 0 : i32
    %c0_i32_1 = arith.constant 0 : i32
    return %c0_i32, %c0_i32_0 : i32, i32
  }
  func.func @transform_5(%arg0: i32, %arg1: i32) -> (i32, i32) {
    %c0_i32 = arith.constant 0 : i32
    %c0_i32_0 = arith.constant 0 : i32
    %c0_i32_1 = arith.constant 0 : i32
    return %c0_i32, %c0_i32_0 : i32, i32
  }
  func.func @transform_6(%arg0: i32, %arg1: i32) -> i32 {
    %c0_i32 = arith.constant 0 : i32
    %c0_i32_0 = arith.constant 0 : i32
    return %c0_i32 : i32
  }
  func.func @transform_7(%arg0: i32, %arg1: i32) -> (i32, i32, i32) {
    %c0_i32 = arith.constant 0 : i32
    %c0_i32_0 = arith.constant 0 : i32
    return %arg0, %c0_i32, %arg1 : i32, i32, i32
  }
}

</mosaic_0001>

<bundles_post_ra>
// kernel: attention_block.1
= control target key start
LH: loop header
LB: loop body
LE: loop exit
PB: predicated region body
PF: predicated region fallthrough
CT: control target
= control target key end

     0   :  { %s1904_s26 = smov 0   ;;  %s1906_s27 = smov 0   ;;  %s2252_s0 = inlined_call_operand.vmem [shape: f32[2,32,1024], index: 0, kind: input, shape index: {}]   ;;  %s2253_s1 = inlined_call_operand.vmem [shape: f32[2,32,1024], index: 1, kind: input, shape index: {}]   ;;  %s2254_s2 = inlined_call_operand.vmem [shape: f32[16,32], index: 2, kind: input, shape index: {}]   ;;  %s2255_s3 = inlined_call_operand.vmem [shape: f32[16,32], index: 3, kind: input, shape index: {}]   ;;  %s2256_s4 = inlined_call_operand.vmem [shape: f32[16,1], index: 4, kind: input, shape index: {}]   ;;  %s2257_s5 = inlined_call_operand.vmem [shape: f32[1,16], index: 5, kind: input, shape index: {}]   ;;  %s2258_s6 = inlined_call_operand.<no memory space> [shape: f32[1], index: 6, kind: input, shape index: {}]   ;;  %s2259_s7 = inlined_call_operand.vmem [shape: f32[2,32,1024], index: 7, kind: output, shape index: {}]  }
   0x1   :  { %12 = sst [smem:[#allocation2]] %s2258_s6  ;;  %s1908_s28 = smov 0  }
   0x2 LB: > { %s30_s6 = sadd.s32 1, %s1853_s27  ;;  %p1640_p0 = scmp.ge.s32.totalorder %s1857_s28, 1  ;;  %s1857_s28 = sphi %s1908_s28, %s18_s28   ;;  %s1853_s27 = sphi %s1906_s27, %s2261_s27   ;;  %s1849_s26 = sphi %s1904_s26, %s2260_s26  }
   0x3   : > { %p32_p1 = scmp.ge.s32.totalorder %s30_s6, 2  ;;  %p276_p2 = scmp.lt.s32.totalorder %s1857_s28, 3 }
   0x5   : > { %s2263_s6 = smov (%p32_p1, %s30_s6), 0  ;;  %p277_p3 = pnand %p1640_p0, %p276_p2 }
   0x6   : > { %p326_p4 = scmp.lt.s32.totalorder (!%p277_p3), %s1849_s26, 1  ;;  %v1859_v0 = vmov (!%p277_p3), 0.0   ;;  %v1052_v1 = vld [vmem:[%s2256_s4] sm:$0xff] (!%p277_p3)  ;;  %v1860_v2 = vmov (!%p277_p3), 0   ;;  %v1053_v3 = vld [vmem:[%s2256_s4 + $0x8] sm:$0xff] (!%p277_p3)  ;;  %vm423_vm0 = vcmask (!%p277_p3), 261120  }
   0x7   : > { %280 = sbr.rel (%p277_p3) target bundleno = 532 (0x214), region = 48  ;;  %494 = vmatprep.mubr.f32.mxu0 (!%p277_p3), %v1859_v0  ;;  %571 = vmatprep.mubr.f32.mxu1 (!%p277_p3), %v1859_v0  ;;  %v2011_v30 = vld [vmem:[%s2255_s3] sm:$0xff] (!%p277_p3)  ;;  %v422_v53 = vld [vmem:[%s2255_s3 + $0x8] sm:$0xff] (!%p277_p3)  ;;  %vm1099_vm1 = vcmask (!%p277_p3), 130048   ;;  %s1097_s29 = sld [smem:[#allocation2]] (!%p277_p3) }
   0x8   : > { %1802 = vset.pattern.permute.xlu0 (!%p277_p3), %v1860_v2 }
   0x9   : > { %1056 = vperm.xlu0 (!%p277_p3), %1802, %v1052_v1  }
   0xd   : > { %1061 = vperm.xlu0 (!%p277_p3), %1802, %v1053_v3  }
   0xe   : > { %s2265_s26 = smov (!%p326_p4, %s1849_s26), 1 }
   0xf   : > { %s1927_s8 = sshll.u32 %s2265_s26, 8 }
  0x10   : > { %s1936_s13 = scalar_lea.vmem %s2253_s1, %s1927_s8  ;;  %s2050_s18 = scalar_lea.vmem %s2252_s0, %s1927_s8 }
  0x11   : > { %v1939_v4 = vld [vmem:[%s1936_s13 + $0x8] sm:$0xff]  ;;  %v1945_v6 = vld [vmem:[%s1936_s13 + $0x18] sm:$0xff]  ;;  %v1953_v9 = vld [vmem:[%s1936_s13] sm:$0xff]  ;;  %s2170_s10 = scalar_lea.vmem %s2259_s7, %s1927_s8 }
  0x12   : > { %v1942_v5 = vld [vmem:[%s1936_s13 + $0x48] sm:$0xff]  ;;  %v1950_v8 = vld [vmem:[%s1936_s13 + $0x58] sm:$0xff]  ;;  %v1956_v10 = vld [vmem:[%s1936_s13 + $0x40] sm:$0xff] }
  0x13   : > { %v1680_v7 = vpack.c.bf16 %v1942_v5, %v1939_v4  ;;  %v1688_v11 = vpack.c.bf16 %v1950_v8, %v1945_v6  ;;  %v1682_v12 = vpack.c.bf16 %v1956_v10, %v1953_v9  ;;  %v1963_v13 = vld [vmem:[%s1936_s13 + $0x10] sm:$0xff]  ;;  %v1969_v15 = vld [vmem:[%s1936_s13 + $0x88] sm:$0xff]  ;;  %v1977_v18 = vld [vmem:[%s1936_s13 + $0x98] sm:$0xff] }
  0x14   : > { %v1966_v14 = vld [vmem:[%s1936_s13 + $0x50] sm:$0xff]  ;;  %v1974_v17 = vld [vmem:[%s1936_s13 + $0xc8] sm:$0xff]  ;;  %v1980_v19 = vld [vmem:[%s1936_s13 + $0xd8] sm:$0xff] }
  0x15   : > { %1681 = vmatprep.subr.bf16.mxu0 %v1680_v7  ;;  %v1690_v16 = vpack.c.bf16 %v1966_v14, %v1963_v13  ;;  %1689 = vmatprep.subr.bf16.mxu1 %v1688_v11  ;;  %v1684_v20 = vpack.c.bf16 %v1974_v17, %v1969_v15  ;;  %v1692_v21 = vpack.c.bf16 %v1980_v19, %v1977_v18  ;;  %v1987_v22 = vld [vmem:[%s1936_s13 + $0x80] sm:$0xff]  ;;  %v1993_v24 = vld [vmem:[%s1936_s13 + $0x90] sm:$0xff]  ;;  %v2001_v27 = vld [vmem:[%s1936_s13 + $0x28] sm:$0xff] }
  0x16   : > { %1683 = vmatpush1.bf16.msra.mxu0 %v1682_v12  ;;  %v1990_v23 = vld [vmem:[%s1936_s13 + $0xc0] sm:$0xff]  ;;  %v1998_v26 = vld [vmem:[%s1936_s13 + $0xd0] sm:$0xff]  ;;  %v2004_v28 = vld [vmem:[%s1936_s13 + $0x68] sm:$0xff] }
  0x17   : > { %1691 = vmatpush1.bf16.msra.mxu1 %v1690_v16  ;;  %v1686_v25 = vpack.c.bf16 %v1990_v23, %v1987_v22  ;;  %1685 = vmatprep.subr.bf16.mxu0 %v1684_v20  ;;  %v1694_v29 = vpack.c.bf16 %v1998_v26, %v1993_v24  ;;  %v1696_v31 = vpack.c.bf16 %v2004_v28, %v2001_v27  ;;  %v2016_v32 = vld [vmem:[%s1936_s13 + $0x38] sm:$0xff]  ;;  %v2022_v34 = vld [vmem:[%s1936_s13 + $0x20] sm:$0xff]  ;;  %v2030_v37 = vld [vmem:[%s1936_s13 + $0x30] sm:$0xff] }
  0x18   : > { %1693 = vmatprep.subr.bf16.mxu1 %v1692_v21  ;;  %v2019_v33 = vld [vmem:[%s1936_s13 + $0x78] sm:$0xff]  ;;  %v2027_v36 = vld [vmem:[%s1936_s13 + $0x60] sm:$0xff]  ;;  %v2033_v38 = vld [vmem:[%s1936_s13 + $0x70] sm:$0xff] }
  0x19   : > { %v1704_v35 = vpack.c.bf16 %v2019_v33, %v2016_v32  ;;  %v1698_v39 = vpack.c.bf16 %v2027_v36, %v2022_v34  ;;  %v2038_v40 = vld [vmem:[%s1936_s13 + $0xa8] sm:$0xff]  ;;  %v2044_v42 = vld [vmem:[%s1936_s13 + $0xb8] sm:$0xff]  ;;  %v1706_v43 = vpack.c.bf16 %v2033_v38, %v2030_v37  ;;  %v2058_v45 = vld [vmem:[%s1936_s13 + $0xa0] sm:$0xff] }
  0x1a   : > { %1687 = vmatpush1.bf16.msra.mxu0 %v1686_v25  ;;  %v2041_v41 = vld [vmem:[%s1936_s13 + $0xe8] sm:$0xff]  ;;  %v2055_v44 = vld [vmem:[%s1936_s13 + $0xf8] sm:$0xff]  ;;  %v2061_v46 = vld [vmem:[%s1936_s13 + $0xe0] sm:$0xff] }
  0x1b   : > { %1695 = vmatpush1.bf16.msra.mxu1 %v1694_v29  ;;  %1697 = vmatprep.subr.bf16.mxu0 %v1696_v31  ;;  %v1700_v47 = vpack.c.bf16 %v2041_v41, %v2038_v40  ;;  %v2066_v48 = vld [vmem:[%s1936_s13 + $0xb0] sm:$0xff]  ;;  %v1708_v50 = vpack.c.bf16 %v2055_v44, %v2044_v42  ;;  %v356_v51 = vld [vmem:[%s2050_s18 + $0x8] sm:$0xff]  ;;  %v1702_v54 = vpack.c.bf16 %v2061_v46, %v2058_v45  ;;  %v358_v55 = vld [vmem:[%s2050_s18 + $0x18] sm:$0xff] }
  0x1c   : > { %1705 = vmatprep.subr.bf16.mxu1 %v1704_v35  ;;  %v2069_v49 = vld [vmem:[%s1936_s13 + $0xf0] sm:$0xff]  ;;  %v364_v52 = vld [vmem:[%s2050_s18 + $0x48] sm:$0xff]  ;;  %v366_v56 = vld [vmem:[%s2050_s18 + $0x58] sm:$0xff] }
  0x1d   : > { %1647 = vmatmul.mubr.msk.f32.vlgmr.msra.gmra.mrb[0].mxu0 %vm423_vm0, %v2011_v30  ;;  %v1710_v57 = vpack.c.bf16 %v2069_v49, %v2066_v48  ;;  %v355_v58 = vld [vmem:[%s2050_s18] sm:$0xff]  ;;  %v1712_v60 = vpack.c.bf16 %v364_v52, %v356_v51  ;;  %v357_v61 = vld [vmem:[%s2050_s18 + $0x10] sm:$0xff]  ;;  %v1720_v63 = vpack.c.bf16 %v366_v56, %v358_v55  ;;  %v372_v1 = vld [vmem:[%s2050_s18 + $0x88] sm:$0xff] }
  0x1e   : > { %1649 = vmatmul.mubr.msk.f32.vlgmr.msra.gmra.mrb[0].mxu1 %vm423_vm0, %v2011_v30  ;;  %1699 = vmatpush1.bf16.msra.mxu0 %v1698_v39  ;;  %v363_v59 = vld [vmem:[%s2050_s18 + $0x40] sm:$0xff]  ;;  %v365_v62 = vld [vmem:[%s2050_s18 + $0x50] sm:$0xff]  ;;  %v380_v2 = vld [vmem:[%s2050_s18 + $0xc8] sm:$0xff] }
  0x1f   : > { %1707 = vmatpush1.bf16.msra.mxu1 %v1706_v43  ;;  %500 = vmatprep.mubr.f32.mxu0 %v1859_v0  ;;  %v1714_v3 = vpack.c.bf16 %v363_v59, %v355_v58  ;;  %v374_v7 = vld [vmem:[%s2050_s18 + $0x98] sm:$0xff]  ;;  %v1722_v12 = vpack.c.bf16 %v365_v62, %v357_v61  ;;  %v371_v16 = vld [vmem:[%s2050_s18 + $0x80] sm:$0xff]  ;;  %v1716_v21 = vpack.c.bf16 %v380_v2, %v372_v1  ;;  %v373_v25 = vld [vmem:[%s2050_s18 + $0x90] sm:$0xff] }
  0x20   : > { %577 = vmatprep.mubr.f32.mxu1 %v1859_v0  ;;  %1701 = vmatprep.subr.bf16.mxu0 %v1700_v47  ;;  %v382_v11 = vld [vmem:[%s2050_s18 + $0xd8] sm:$0xff]  ;;  %v379_v20 = vld [vmem:[%s2050_s18 + $0xc0] sm:$0xff]  ;;  %v381_v29 = vld [vmem:[%s2050_s18 + $0xd0] sm:$0xff] }
  0x21   : > { %1648 = vmatmul.mubr.msk.f32.gmra.mrb[2].mxu0 %vm423_vm0, %v422_v53  ;;  %1709 = vmatprep.subr.bf16.mxu1 %v1708_v50  ;;  %v1724_v31 = vpack.c.bf16 %v382_v11, %v374_v7  ;;  %v360_v35 = vld [vmem:[%s2050_s18 + $0x28] sm:$0xff]  ;;  %v1718_v43 = vpack.c.bf16 %v379_v20, %v371_v16  ;;  %v362_v47 = vld [vmem:[%s2050_s18 + $0x38] sm:$0xff]  ;;  %v1726_v51 = vpack.c.bf16 %v381_v29, %v373_v25  ;;  %v359_v52 = vld [vmem:[%s2050_s18 + $0x20] sm:$0xff] }
  0x22   : > { %1650 = vmatmul.mubr.msk.f32.gmra.mrb[2].mxu1 %vm423_vm0, %v422_v53  ;;  %1703 = vmatpush1.bf16.msra.mxu0 %v1702_v54  ;;  %v368_v39 = vld [vmem:[%s2050_s18 + $0x68] sm:$0xff]  ;;  %v370_v50 = vld [vmem:[%s2050_s18 + $0x78] sm:$0xff]  ;;  %v367_v54 = vld [vmem:[%s2050_s18 + $0x60] sm:$0xff] }
  0x23   : > { %1711 = vmatpush1.bf16.msra.mxu1 %v1710_v57  ;;  %648 = vmatprep.mubr.f32.mxu0 %v1859_v0  ;;  %v1728_v55 = vpack.c.bf16 %v368_v39, %v360_v35  ;;  %v361_v56 = vld [vmem:[%s2050_s18 + $0x30] sm:$0xff]  ;;  %v1736_v57 = vpack.c.bf16 %v370_v50, %v362_v47  ;;  %v376_v58 = vld [vmem:[%s2050_s18 + $0xa8] sm:$0xff]  ;;  %v1730_v61 = vpack.c.bf16 %v367_v54, %v359_v52  ;;  %v378_v62 = vld [vmem:[%s2050_s18 + $0xb8] sm:$0xff] }
  0x24   : > { %725 = vmatprep.mubr.f32.mxu1 %v1859_v0  ;;  %1713 = vmatprep.subr.bf16.mxu0 %v1712_v60  ;;  %v384_v59 = vld [vmem:[%s2050_s18 + $0xe8] sm:$0xff]  ;;  %v419_v60 = vld [vmem:[%s2254_s2] sm:$0xff]  ;;  %v377_v11 = vld [vmem:[%s2050_s18 + $0xb0] sm:$0xff] }
  0x25   : > { %1651 = vmatmul.mubr.msk.f32.vlgmr.msra.gmra.mrb[4].mxu0 %vm423_vm0, %v2011_v30  ;;  %1721 = vmatprep.subr.bf16.mxu1 %v1720_v63  ;;  %v386_v63 = vld [vmem:[%s2050_s18 + $0xf8] sm:$0xff]  ;;  %v375_v2 = vld [vmem:[%s2050_s18 + $0xa0] sm:$0xff]  ;;  %v1732_v7 = vpack.c.bf16 %v384_v59, %v376_v58  ;;  %v420_v16 = vld [vmem:[%s2254_s2 + $0x8] sm:$0xff] }
  0x26   : > { %1653 = vmatmul.mubr.msk.f32.vlgmr.msra.gmra.mrb[4].mxu1 %vm423_vm0, %v2011_v30  ;;  %1715 = vmatpush1.bf16.msra.mxu0 %v1714_v3  ;;  %v369_v30 = vld [vmem:[%s2050_s18 + $0x70] sm:$0xff]  ;;  %v383_v3 = vld [vmem:[%s2050_s18 + $0xe0] sm:$0xff] }
  0x27   : > { %1723 = vmatpush1.bf16.msra.mxu1 %v1722_v12  ;;  %654 = vmatprep.mubr.f32.mxu0 %v1859_v0  ;;  %v1738_v1 = vpack.c.bf16 %v369_v30, %v361_v56  ;;  %v1740_v12 = vpack.c.bf16 %v386_v63, %v378_v62  ;;  %v1734_v20 = vpack.c.bf16 %v383_v3, %v375_v2 }
  0x28   : > { %731 = vmatprep.mubr.f32.mxu1 %v1859_v0  ;;  %1717 = vmatprep.subr.bf16.mxu0 %v1716_v21 }
  0x29   : > { %1652 = vmatmul.mubr.msk.f32.gmra.mrb[6].mxu0 %vm423_vm0, %v422_v53  ;;  %1725 = vmatprep.subr.bf16.mxu1 %v1724_v31 }
  0x2a   : > { %1654 = vmatmul.mubr.msk.f32.gmra.mrb[6].mxu1 %vm423_vm0, %v422_v53  ;;  %1719 = vmatpush1.bf16.msra.mxu0 %v1718_v43  ;;  %v385_v53 = vld [vmem:[%s2050_s18 + $0xf0] sm:$0xff] }
  0x2b   : > { %1727 = vmatpush1.bf16.msra.mxu1 %v1726_v51  ;;  %808 = vmatprep.mubr.f32.mxu0 %v1859_v0  ;;  %v1742_v21 = vpack.c.bf16 %v385_v53, %v377_v11 }
  0x2c   : > { %885 = vmatprep.mubr.f32.mxu1 %v1859_v0  ;;  %1729 = vmatprep.subr.bf16.mxu0 %v1728_v55 }
  0x2d   : > { %1655 = vmatmul.mubr.msk.f32.vlgmr.msra.gmra.mrb[0].mxu0 %vm423_vm0, %v419_v60  ;;  %1737 = vmatprep.subr.bf16.mxu1 %v1736_v57 }
  0x2e   : > { %1657 = vmatmul.mubr.msk.f32.vlgmr.msra.gmra.mrb[0].mxu1 %vm423_vm0, %v419_v60  ;;  %1731 = vmatpush1.bf16.msra.mxu0 %v1730_v61 }
  0x2f   : > { %1739 = vmatpush1.bf16.msra.mxu1 %v1738_v1  ;;  %814 = vmatprep.mubr.f32.mxu0 %v1859_v0 }
  0x30   : > { %891 = vmatprep.mubr.f32.mxu1 %v1859_v0  ;;  %1733 = vmatprep.subr.bf16.mxu0 %v1732_v7 }
  0x31   : > { %1656 = vmatmul.mubr.msk.f32.gmra.mrb[2].mxu0 %vm423_vm0, %v420_v16  ;;  %1741 = vmatprep.subr.bf16.mxu1 %v1740_v12 }
  0x32   : > { %1658 = vmatmul.mubr.msk.f32.gmra.mrb[2].mxu1 %vm423_vm0, %v420_v16  ;;  %1735 = vmatpush1.bf16.msra.mxu0 %v1734_v20 }
  0x33   : > { %1743 = vmatpush1.bf16.msra.mxu1 %v1742_v21  ;;  %962 = vmatprep.mubr.f32.mxu0 %v1859_v0 }
  0x34   : > { %1039 = vmatprep.mubr.f32.mxu1 %v1859_v0 }
  0x35   : > { %1659 = vmatmul.mubr.msk.f32.vlgmr.msra.gmra.mrb[4].mxu0 %vm423_vm0, %v419_v60 }
  0x36   : > { %1661 = vmatmul.mubr.msk.f32.vlgmr.msra.gmra.mrb[4].mxu1 %vm423_vm0, %v419_v60  ;;  %968 = vmatprep.mubr.f32.mxu0 %v1859_v0 }
  0x37   : > { %1045 = vmatprep.mubr.f32.mxu1 %v1859_v0 }
  0x39   : > { %1660 = vmatmul.mubr.msk.f32.gmra.mrb[6].mxu0 %vm423_vm0, %v420_v16 }
  0x3a   : > { %1662 = vmatmul.mubr.msk.f32.gmra.mrb[6].mxu1 %vm423_vm0, %v420_v16  ;;  %1167 = vmatprep.mubr.f32.mxu0 %v1859_v0 }
  0x3b   : > { %1238 = vmatprep.mubr.f32.mxu1 %v1859_v0 }
  0x88   : > { %v1057_v25 = vpop.permute.xlu0 %1056 }
  0x8c   : > { %v1062_v39 = vpop.permute.xlu0 %1061 }
 0x100   : > { %v810_v29 = vpop.f32.mrb[0].mxu0 }
 0x101   : > { %v887_v31 = vpop.f32.mrb[0].mxu1  ;;  %v812_v35 = vpop.f32.mrb[1].mxu0  ;;  %v1064_v47 = vadd.f32 %v1057_v25, %v810_v29 }
 0x102   : > { %v889_v43 = vpop.f32.mrb[1].mxu1  ;;  %v1066_v50 = vadd.f32 %v1057_v25, %v887_v31  ;;  %v1065_v51 = vadd.f32 %v1057_v25, %v812_v35 }
 0x103   : > { %v1067_v54 = vadd.f32 %v1057_v25, %v889_v43  ;;  %v1080_v60 = vmax.f32 %v1064_v47, 0.0 }
 0x104   : > { %v816_v52 = vpop.f32.mrb[2].mxu0  ;;  %v1082_v63 = vmax.f32 %v1066_v50, 0.0  ;;  %v1081_v1 = vmax.f32 %v1065_v51, 0.0 }
 0x105   : > { %v1072_v55 = vadd.f32 %v1062_v39, %v816_v52  ;;  %v893_v56 = vpop.f32.mrb[2].mxu1  ;;  %v818_v30 = vpop.f32.mrb[3].mxu0  ;;  %v1083_v11 = vmax.f32 %v1067_v54, 0.0  ;;  %v1096_v54 = vld [vmem:[%s2257_s5] sm:$0x1] }
 0x106   : > { %v1074_v57 = vadd.f32 %v1062_v39, %v893_v56  ;;  %v1073_v58 = vadd.f32 %v1062_v39, %v818_v30  ;;  %v895_v59 = vpop.f32.mrb[3].mxu1 }
 0x107   : > { %v1088_v61 = vmax.f32 %v1072_v55, 0.0  ;;  %v1075_v62 = vadd.f32 %v1062_v39, %v895_v59 }
 0x108   : > { %v1090_v2 = vmax.f32 %v1074_v57, 0.0  ;;  %v1089_v3 = vmax.f32 %v1073_v58, 0.0  ;;  %v964_v7 = vpop.f32.mrb[4].mxu0 }
 0x109   : > { %v1746_v53 = vpack.c.bf16 %v1088_v61, %v1080_v60  ;;  %v1091_v12 = vmax.f32 %v1075_v62, 0.0  ;;  %v1041_v16 = vpop.f32.mrb[4].mxu1  ;;  %v966_v20 = vpop.f32.mrb[5].mxu0  ;;  %v1068_v43 = vadd.f32 %v1057_v25, %v964_v7 }
 0x10a   : > { %v1750_v21 = vpack.c.bf16 %v1090_v2, %v1082_v63  ;;  %v1744_v29 = vpack.c.bf16 %v1089_v3, %v1081_v1  ;;  %v1043_v31 = vpop.f32.mrb[5].mxu1  ;;  %v1070_v52 = vadd.f32 %v1057_v25, %v1041_v16  ;;  %v1069_v56 = vadd.f32 %v1057_v25, %v966_v20 }
 0x10b   : > { %v1748_v35 = vpack.c.bf16 %v1091_v12, %v1083_v11  ;;  %v1071_v55 = vadd.f32 %v1057_v25, %v1043_v31  ;;  %v1084_v60 = vmax.f32 %v1068_v43, 0.0 }
 0x10c   : > { %v970_v47 = vpop.f32.mrb[6].mxu0  ;;  %1745 = vmatprep.subr.bf16.mxu0 %v1744_v29  ;;  %v1086_v63 = vmax.f32 %v1070_v52, 0.0  ;;  %v1085_v1 = vmax.f32 %v1069_v56, 0.0 }
 0x10d   : > { %v1076_v50 = vadd.f32 %v1062_v39, %v970_v47  ;;  %v1047_v51 = vpop.f32.mrb[6].mxu1  ;;  %1749 = vmatprep.subr.bf16.mxu1 %v1748_v35  ;;  %v972_v30 = vpop.f32.mrb[7].mxu0  ;;  %1747 = vmatpush1.bf16.msra.mxu0 %v1746_v53  ;;  %v1087_v3 = vmax.f32 %v1071_v55, 0.0 }
 0x10e   : > { %v1078_v57 = vadd.f32 %v1062_v39, %v1047_v51  ;;  %v1077_v58 = vadd.f32 %v1062_v39, %v972_v30  ;;  %v1049_v59 = vpop.f32.mrb[7].mxu1  ;;  %1751 = vmatpush1.bf16.msra.mxu1 %v1750_v21 }
 0x10f   : > { %v1092_v61 = vmax.f32 %v1076_v50, 0.0  ;;  %v1079_v62 = vadd.f32 %v1062_v39, %v1049_v59  ;;  %v1098_v39 = vstv %s1097_s29 }
 0x110   : > { %v1094_v25 = vmax.f32 %v1078_v57, 0.0  ;;  %v1093_v2 = vmax.f32 %v1077_v58, 0.0  ;;  %1663 = vmatmul.mubr.msk.f32.vlgmr.msra.gmra.mrb[8].mxu0 %vm1099_vm1, %v1096_v54 }
 0x111   : > { %v1754_v7 = vpack.c.bf16 %v1092_v61, %v1084_v60  ;;  %v1095_v11 = vmax.f32 %v1079_v62, 0.0  ;;  %1664 = vmatmul.mubr.msk.f32.vlgmr.msra.gmra.mrb[8].mxu1 %vm1099_vm1, %v1096_v54  ;;  %1309 = vmatprep.mubr.f32.mxu0 %v1859_v0 }
 0x112   : > { %v1758_v53 = vpack.c.bf16 %v1094_v25, %v1086_v63  ;;  %v1752_v12 = vpack.c.bf16 %v1093_v2, %v1085_v1  ;;  %1380 = vmatprep.mubr.f32.mxu1 %v1859_v0 }
 0x113   : > { %v1756_v16 = vpack.c.bf16 %v1095_v11, %v1087_v3 }
 0x114   : > { %1753 = vmatprep.subr.bf16.mxu0 %v1752_v12 }
 0x115   : > { %1757 = vmatprep.subr.bf16.mxu1 %v1756_v16  ;;  %1755 = vmatpush1.bf16.msra.mxu0 %v1754_v7 }
 0x116   : > { %1759 = vmatpush1.bf16.msra.mxu1 %v1758_v53  ;;  %v1435_v53 = vlaneseq }
 0x118   : > { %1665 = vmatmul.mubr.msk.f32.vlgmr.msra.gmra.mrb[10].mxu0 %vm1099_vm1, %v1096_v54 }
 0x119   : > { %1666 = vmatmul.mubr.msk.f32.vlgmr.msra.gmra.mrb[10].mxu1 %vm1099_vm1, %v1096_v54 }
 0x1e3   : > { %v1169_v20 = vpop.f32.mrb[8].mxu0 }
 0x1e4   : > { %v1170_v21 = vadd.f32 %v1169_v20, %v1098_v39  ;;  %v1240_v29 = vpop.f32.mrb[8].mxu1  ;;  %v1171_v31 = vpop.f32.mrb[9].mxu0 }
 0x1e5   : > { %v1241_v35 = vadd.f32 %v1240_v29, %v1098_v39  ;;  %v1172_v43 = vadd.f32 %v1171_v31, %v1098_v39  ;;  %v1242_v52 = vpop.f32.mrb[9].mxu1 }
 0x1e6   : > { %v1667_v56 = vmul.f32 -1.442695, %v1170_v21  ;;  %v1243_v0 = vadd.f32 %v1242_v52, %v1098_v39 }
 0x1e7   : > { %v1669_v47 = vmul.f32 -1.442695, %v1241_v35  ;;  %v1668_v55 = vmul.f32 -1.442695, %v1172_v43 }
 0x1e8   : > { %1803 = vpow2.f32 %v1667_v56  ;;  %v1670_v50 = vmul.f32 -1.442695, %v1243_v0 }
 0x1e9   : > { %1805 = vpow2.f32 %v1669_v47 }
 0x1ea   : > { %1807 = vpow2.f32 %v1668_v55 }
 0x1eb   : > { %1809 = vpow2.f32 %v1670_v50  ;;  %v1311_v51 = vpop.f32.mrb[10].mxu0 }
 0x1ec   : > { %v1312_v30 = vadd.f32 %v1311_v51, %v1098_v39  ;;  %v1382_v54 = vpop.f32.mrb[10].mxu1  ;;  %v1313_v57 = vpop.f32.mrb[11].mxu0 }
 0x1ed   : > { %v1383_v58 = vadd.f32 %v1382_v54, %v1098_v39  ;;  %v1314_v59 = vadd.f32 %v1313_v57, %v1098_v39  ;;  %v1384_v60 = vpop.f32.mrb[11].mxu1 }
 0x1ee   : > { %v1671_v61 = vmul.f32 -1.442695, %v1312_v30  ;;  %v1385_v62 = vadd.f32 %v1384_v60, %v1098_v39  ;;  %v1436_v39 = vshrl.u32 %v1435_v53, 7 }
 0x1ef   : > { %v1673_v63 = vmul.f32 -1.442695, %v1383_v58  ;;  %v1672_v1 = vmul.f32 -1.442695, %v1314_v59 }
 0x1f0   : > { %1811 = vpow2.f32 %v1671_v61  ;;  %v1674_v25 = vmul.f32 -1.442695, %v1385_v62  ;;  %v2163_v52 = vsub.s32 0, %v1436_v39 }
 0x1f1   : > { %1813 = vpow2.f32 %v1673_v63 }
 0x1f2   : > { %v1804_v2 = vpop.eup %1803  ;;  %1815 = vpow2.f32 %v1672_v1 }
 0x1f3   : > { %v1806_v3 = vpop.eup %1805  ;;  %v1411_v7 = vadd.f32 1.0, %v1804_v2  ;;  %1817 = vpow2.f32 %v1674_v25 }
 0x1f4   : > { %v1808_v11 = vpop.eup %1807  ;;  %v1413_v12 = vadd.f32 1.0, %v1806_v3 }
 0x1f5   : > { %v1810_v16 = vpop.eup %1809  ;;  %1819 = vrcp.f32 %v1411_v7  ;;  %v1412_v20 = vadd.f32 1.0, %v1808_v11 }
 0x1f6   : > { %1821 = vrcp.f32 %v1413_v12  ;;  %v1414_v21 = vadd.f32 1.0, %v1810_v16 }
 0x1f7   : > { %1823 = vrcp.f32 %v1412_v20 }
 0x1f8   : > { %1825 = vrcp.f32 %v1414_v21 }
 0x1fa   : > { %v1812_v29 = vpop.eup %1811 }
 0x1fb   : > { %v1814_v31 = vpop.eup %1813  ;;  %v1415_v35 = vadd.f32 1.0, %v1812_v29 }
 0x1fc   : > { %v1816_v43 = vpop.eup %1815  ;;  %v1417_v56 = vadd.f32 1.0, %v1814_v31 }
 0x1fd   : > { %v1818_v0 = vpop.eup %1817  ;;  %1827 = vrcp.f32 %v1415_v35  ;;  %v1416_v47 = vadd.f32 1.0, %v1816_v43 }
 0x1fe   : > { %1829 = vrcp.f32 %v1417_v56  ;;  %v1418_v55 = vadd.f32 1.0, %v1818_v0 }
 0x1ff   : > { %v1820_v50 = vpop.eup %1819  ;;  %1831 = vrcp.f32 %v1416_v47 }
 0x200   : > { %v1822_v51 = vpop.eup %1821  ;;  %v1438_v30 = vrot.slane %v1820_v50, %v2163_v52  ;;  %1833 = vrcp.f32 %v1418_v55 }
 0x201   : > { %v1824_v54 = vpop.eup %1823  ;;  %v1446_v57 = vrot.slane %v1822_v51, %v2163_v52 }
 0x202   : > { %v1826_v58 = vpop.eup %1825  ;;  %v1467_v59 = vmul.f32 %v1438_v30, %v1953_v9  ;;  %v1475_v60 = vmul.f32 %v1438_v30, %v1956_v10  ;;  %v1483_v61 = vmul.f32 %v1438_v30, %v1987_v22  ;;  %v1491_v62 = vmul.f32 %v1438_v30, %v1990_v23 }
 0x203   : > { %v1469_v63 = vmul.f32 %v1446_v57, %v1963_v13  ;;  %v1477_v1 = vmul.f32 %v1446_v57, %v1966_v14  ;;  %v1485_v25 = vmul.f32 %v1446_v57, %v1993_v24  ;;  %v1493_v2 = vmul.f32 %v1446_v57, %v1998_v26 }
 0x204   : > { %1499 = vst [vmem:[%s2170_s10] sm:$0xff] %v1467_v59  ;;  %1507 = vst [vmem:[%s2170_s10 + $0x40] sm:$0xff] %v1475_v60  ;;  %v1442_v9 = vrot.slane %v1824_v54, %v2163_v52  ;;  %v1450_v10 = vrot.slane %v1826_v58, %v2163_v52 }
 0x205   : > { %1515 = vst [vmem:[%s2170_s10 + $0x80] sm:$0xff] %v1483_v61  ;;  %1523 = vst [vmem:[%s2170_s10 + $0xc0] sm:$0xff] %v1491_v62 }
 0x206   : > { %1501 = vst [vmem:[%s2170_s10 + $0x10] sm:$0xff] %v1469_v63  ;;  %1509 = vst [vmem:[%s2170_s10 + $0x50] sm:$0xff] %v1477_v1  ;;  %v1468_v13 = vmul.f32 %v1442_v9, %v1939_v4  ;;  %v1476_v14 = vmul.f32 %v1442_v9, %v1942_v5  ;;  %v1484_v22 = vmul.f32 %v1442_v9, %v1969_v15 }
 0x207   : > { %1517 = vst [vmem:[%s2170_s10 + $0x90] sm:$0xff] %v1485_v25  ;;  %1525 = vst [vmem:[%s2170_s10 + $0xd0] sm:$0xff] %v1493_v2  ;;  %v1492_v23 = vmul.f32 %v1442_v9, %v1974_v17  ;;  %v1828_v24 = vpop.eup %1827  ;;  %v1470_v26 = vmul.f32 %v1450_v10, %v1945_v6  ;;  %v1478_v3 = vmul.f32 %v1450_v10, %v1950_v8 }
 0x208   : > { %v1486_v7 = vmul.f32 %v1450_v10, %v1977_v18  ;;  %v1494_v11 = vmul.f32 %v1450_v10, %v1980_v19  ;;  %v1830_v4 = vpop.eup %1829  ;;  %1500 = vst [vmem:[%s2170_s10 + $0x8] sm:$0xff] %v1468_v13  ;;  %1508 = vst [vmem:[%s2170_s10 + $0x48] sm:$0xff] %v1476_v14  ;;  %v1454_v5 = vrot.slane %v1828_v24, %v2163_v52 }
 0x209   : > { %1516 = vst [vmem:[%s2170_s10 + $0x88] sm:$0xff] %v1484_v22  ;;  %1524 = vst [vmem:[%s2170_s10 + $0xc8] sm:$0xff] %v1492_v23  ;;  %v1832_v15 = vpop.eup %1831  ;;  %v1462_v6 = vrot.slane %v1830_v4, %v2163_v52 }
 0x20a   : > { %1502 = vst [vmem:[%s2170_s10 + $0x18] sm:$0xff] %v1470_v26  ;;  %1510 = vst [vmem:[%s2170_s10 + $0x58] sm:$0xff] %v1478_v3  ;;  %v1834_v8 = vpop.eup %1833  ;;  %v1471_v17 = vmul.f32 %v1454_v5, %v2022_v34  ;;  %v1479_v18 = vmul.f32 %v1454_v5, %v2027_v36  ;;  %v1487_v19 = vmul.f32 %v1454_v5, %v2058_v45 }
 0x20b   : > { %1518 = vst [vmem:[%s2170_s10 + $0x98] sm:$0xff] %v1486_v7  ;;  %1526 = vst [vmem:[%s2170_s10 + $0xd8] sm:$0xff] %v1494_v11  ;;  %v1495_v53 = vmul.f32 %v1454_v5, %v2061_v46  ;;  %v1473_v12 = vmul.f32 %v1462_v6, %v2030_v37  ;;  %v1481_v16 = vmul.f32 %v1462_v6, %v2033_v38 }
 0x20c   : > { %v1489_v20 = vmul.f32 %v1462_v6, %v2066_v48  ;;  %v1497_v21 = vmul.f32 %v1462_v6, %v2069_v49  ;;  %1503 = vst [vmem:[%s2170_s10 + $0x20] sm:$0xff] %v1471_v17  ;;  %1511 = vst [vmem:[%s2170_s10 + $0x60] sm:$0xff] %v1479_v18  ;;  %v1458_v34 = vrot.slane %v1832_v15, %v2163_v52 }
 0x20d   : > { %1519 = vst [vmem:[%s2170_s10 + $0xa0] sm:$0xff] %v1487_v19  ;;  %1527 = vst [vmem:[%s2170_s10 + $0xe0] sm:$0xff] %v1495_v53  ;;  %v1466_v36 = vrot.slane %v1834_v8, %v2163_v52 }
 0x20e   : > { %1505 = vst [vmem:[%s2170_s10 + $0x30] sm:$0xff] %v1473_v12  ;;  %1513 = vst [vmem:[%s2170_s10 + $0x70] sm:$0xff] %v1481_v16  ;;  %v1472_v37 = vmul.f32 %v1458_v34, %v2001_v27  ;;  %v1480_v38 = vmul.f32 %v1458_v34, %v2004_v28  ;;  %v1488_v45 = vmul.f32 %v1458_v34, %v2038_v40 }
 0x20f   : > { %1521 = vst [vmem:[%s2170_s10 + $0xb0] sm:$0xff] %v1489_v20  ;;  %1529 = vst [vmem:[%s2170_s10 + $0xf0] sm:$0xff] %v1497_v21  ;;  %v1496_v46 = vmul.f32 %v1458_v34, %v2041_v41  ;;  %v1474_v48 = vmul.f32 %v1466_v36, %v2016_v32  ;;  %v1482_v49 = vmul.f32 %v1466_v36, %v2019_v33 }
 0x210   : > { %v1490_v39 = vmul.f32 %v1466_v36, %v2044_v42  ;;  %v1498_v29 = vmul.f32 %v1466_v36, %v2055_v44  ;;  %1504 = vst [vmem:[%s2170_s10 + $0x28] sm:$0xff] %v1472_v37  ;;  %1512 = vst [vmem:[%s2170_s10 + $0x68] sm:$0xff] %v1480_v38 }
 0x211   : > { %1520 = vst [vmem:[%s2170_s10 + $0xa8] sm:$0xff] %v1488_v45  ;;  %1528 = vst [vmem:[%s2170_s10 + $0xe8] sm:$0xff] %v1496_v46 }
 0x212   : > { %1506 = vst [vmem:[%s2170_s10 + $0x38] sm:$0xff] %v1474_v48  ;;  %1514 = vst [vmem:[%s2170_s10 + $0x78] sm:$0xff] %v1482_v49 }
 0x213   : > { %1522 = vst [vmem:[%s2170_s10 + $0xb8] sm:$0xff] %v1490_v39  ;;  %1530 = vst [vmem:[%s2170_s10 + $0xf8] sm:$0xff] %v1498_v29 }
 0x214 PF: > { %s18_s28 = sadd.s32 1, %s1857_s28   ;;  %s2260_s26 = smov %s1853_s27 }
 0x215   : > { %p15_p5 = scmp.ge.s32.totalorder %s18_s28, 4   ;;  %s2261_s27 = smov %s2263_s6 }
 0x217   :  { %17 = sbr.rel (!%p15_p5) target bundleno = 2 (0x2), region = 81 }

</bundles_post_ra>
